<compile_context>
chip_gen: v6e
topology: v6e:2x2x1
jax: 0.10.0
libtpu: 0.0.40
codegen_flags: <defaults>
</compile_context>

<pallas_src>
import functools

import jax
import jax.numpy as jnp
from jax import lax
from jax.experimental import pallas as pl
from jax.experimental.pallas import tpu as pltpu


def _inner_product_decoder_kernel(zi_ref, zj_ref, out_ref, *, fast_math):
    """One (bm, bn) output tile: sigmoid(z_i @ z_j^T) with f32 accumulation."""
    compute_dtype = jnp.bfloat16 if fast_math else jnp.float32

    # Fold the 0.5 of sigmoid(x) = 0.5*(tanh(x/2)+1) into the small LHS block
    # (bm*D mults instead of bm*bn).
    zi = (zi_ref[...].astype(jnp.float32) * 0.5).astype(compute_dtype)
    zj = zj_ref[...].astype(compute_dtype)

    # 'nt' contraction: last dim of zi vs last dim of zj -> (bm, bn) on the
    # MXU, no explicit transpose / XLU work. f32 accumulation.
    half_logits = lax.dot_general(
        zi, zj,
        dimension_numbers=(((1,), (1,)), ((), ())),
        preferred_element_type=jnp.float32,
    )

    # EUP-friendly sigmoid; epilogue runs in bf16 on v6e/v7x, f32 on v5e.
    t = jnp.tanh(half_logits.astype(compute_dtype))
    out_ref[...] = (0.5 * (t + 1.0)).astype(out_ref.dtype)


def _has_bf16_vector_units():
    """v6e/v7x have bf16 VPU/EUP paths; v5e and earlier do not."""
    try:
        kind = jax.devices()[0].device_kind.lower()
    except Exception:
        return False
    return not any(tag in kind for tag in ("v2", "v3", "v4", "v5"))


def inner_product_decoder(z, *, dropout_p=0.1, training=True, rng_key=None,
                          dropout_uniform=None, block_m=1024, block_n=1024,
                          out_dtype=jnp.bfloat16, fast_math=None):
    """adj = sigmoid(dropout(z, p) @ dropout(z, p).T), z: [N, D] float32.

    dropout_uniform: optional precomputed U[0,1) array of shape [N, D] (for
    deterministic testing); if None and training, drawn from rng_key.
    out_dtype: bf16 by default (writeback-bound kernel); pass jnp.float32 to
    match PyTorch's dtype exactly.
    fast_math: bf16 matmul inputs + epilogue; None -> auto (on for v6e/v7x).
    """
    N, D = z.shape
    apply_dropout = bool(training) and float(dropout_p) > 0.0
    if fast_math is None:
        fast_math = _has_bf16_vector_units()

    # Dropout prepass (O(N*D), negligible next to the N^2 kernel); the same
    # dropped z feeds both operands, matching PyTorch semantics.
    if apply_dropout:
        if dropout_uniform is None:
            if rng_key is None:
                rng_key = jax.random.PRNGKey(0)
            dropout_uniform = jax.random.uniform(rng_key, (N, D), dtype=jnp.float32)
        keep = dropout_uniform >= jnp.float32(dropout_p)
        z_in = jnp.where(keep, z * (1.0 / (1.0 - float(dropout_p))), 0.0)
        z_in = z_in.astype(jnp.float32)
    else:
        z_in = z.astype(jnp.float32)

    bm = min(int(block_m), N)
    bn = min(int(block_n), N)
    if N % bm != 0 or N % bn != 0:
        raise ValueError(f"N={N} must be divisible by block sizes ({bm}, {bn})")
    grid = (N // bm, N // bn)

    kernel = functools.partial(_inner_product_decoder_kernel, fast_math=bool(fast_math))

    grid_spec = pltpu.PrefetchScalarGridSpec(
        num_scalar_prefetch=0,
        grid=grid,
        in_specs=[
            pl.BlockSpec((bm, D), lambda i, j: (i, 0)),   # LHS row-block (resident across j)
            pl.BlockSpec((bn, D), lambda i, j: (j, 0)),   # RHS row-block (re-fetched per j)
        ],
        out_specs=pl.BlockSpec((bm, bn), lambda i, j: (i, j)),
    )

    out_bytes = jnp.dtype(out_dtype).itemsize
    in_bytes = jnp.dtype(z_in.dtype).itemsize
    grid_i = grid[0]
    cost = pl.CostEstimate(
        flops=2 * N * N * D,
        transcendentals=N * N,
        # output writeback + LHS read once + RHS re-read once per row-block.
        bytes_accessed=out_bytes * N * N + in_bytes * N * D * (1 + grid_i),
    )

    return pl.pallas_call(
        kernel,
        out_shape=jax.ShapeDtypeStruct((N, N), out_dtype),
        grid_spec=grid_spec,
        compiler_params=pltpu.CompilerParams(
            dimension_semantics=("parallel", "parallel"),
            vmem_limit_bytes=32 * 1024 * 1024,
        ),
        cost_estimate=cost,
    )(z_in, z_in)


if __name__ == "__main__":
    key = jax.random.PRNGKey(0)
    kz, ku = jax.random.split(key)

    N, D = 256, 32  # small latent matrix: 256 nodes, 32-dim embeddings
    DROPOUT_P = 0.1
    z = jax.random.normal(kz, (N, D), dtype=jnp.float32)
    u = jax.random.uniform(ku, (N, D), dtype=jnp.float32)

    # 128x128 tiles -> 2x2 output grid (exercises the tiled path at small N)
    adj = inner_product_decoder(z, dropout_p=DROPOUT_P, training=True,
                                dropout_uniform=u, block_m=128, block_n=128)
    adj = jax.block_until_ready(adj)

    # Pure-JAX reference using the exact same dropout draws.
    z_ref = jnp.where(u >= DROPOUT_P, z / (1.0 - DROPOUT_P), 0.0)
    ref = jax.nn.sigmoid(z_ref @ z_ref.T)

    adj32 = adj.astype(jnp.float32)
    assert adj.shape == (N, N)
    assert adj.dtype == jnp.bfloat16
    assert bool(jnp.all(jnp.isfinite(adj32)))
    assert bool(jnp.all(adj32 >= 0.0)) and bool(jnp.all(adj32 <= 1.0))
    assert bool(jnp.allclose(adj32, ref, atol=2e-2, rtol=0.0))

    # Eval-mode (no dropout, no placeholder inputs) smoke test.
    adj_eval = inner_product_decoder(z, dropout_p=DROPOUT_P, training=False,
                                     block_m=128, block_n=128)
    adj_eval = jax.block_until_ready(adj_eval)
    ref_eval = jax.nn.sigmoid(z @ z.T)
    assert bool(jnp.allclose(adj_eval.astype(jnp.float32), ref_eval,
                             atol=2e-2, rtol=0.0))

    print("KERNEL_OK")
</pallas_src>

<mosaic_0001>
module attributes {stable_mosaic.version = 11 : i64} {
  func.func @_inner_product_decoder_kernel(%arg0: i32, %arg1: i32, %arg2: memref<128x32xf32, #tpu.memory_space<vmem>>, %arg3: memref<128x32xf32, #tpu.memory_space<vmem>>, %arg4: memref<128x128xbf16, #tpu.memory_space<vmem>>) attributes {dimension_semantics = [#tpu.dimension_semantics<parallel>, #tpu.dimension_semantics<parallel>], iteration_bounds = array<i64: 2, 2>, scalar_prefetch = 0 : i64, scratch_operands = 0 : i64, tpu.core_type = #tpu.core_type<tc>, window_params = [{transform_indices = @transform_0, window_bounds = array<i64: 128, 32>}, {transform_indices = @transform_1, window_bounds = array<i64: 128, 32>}, {transform_indices = @transform_2, window_bounds = array<i64: 128, 128>}]} {
    %c0 = arith.constant 0 : index
    %c0_0 = arith.constant 0 : index
    %0 = vector.load %arg2[%c0, %c0_0] : memref<128x32xf32, #tpu.memory_space<vmem>>, vector<128x32xf32>
    %cst = arith.constant 5.000000e-01 : f32
    %1 = vector.broadcast %cst : f32 to vector<128x32xf32>
    %2 = arith.mulf %0, %1 : vector<128x32xf32>
    %3 = arith.truncf %2 : vector<128x32xf32> to vector<128x32xbf16>
    %c0_1 = arith.constant 0 : index
    %c0_2 = arith.constant 0 : index
    %4 = vector.load %arg3[%c0_1, %c0_2] : memref<128x32xf32, #tpu.memory_space<vmem>>, vector<128x32xf32>
    %5 = arith.truncf %4 : vector<128x32xf32> to vector<128x32xbf16>
    %cst_3 = arith.constant dense<0.000000e+00> : vector<128x128xf32>
    %6 = tpu.matmul %3, %5, %cst_3 {dimension_numbers = #tpu.dot_dimension_numbers<[1], [1], [0], [0], [0, 0, 1, 0], [], []>} : vector<128x32xbf16>, vector<128x32xbf16>, vector<128x128xf32> -> vector<128x128xf32>
    %7 = arith.truncf %6 : vector<128x128xf32> to vector<128x128xbf16>
    %8 = math.tanh %7 : vector<128x128xbf16>
    %cst_4 = arith.constant 1.000000e+00 : bf16
    %9 = vector.broadcast %cst_4 : bf16 to vector<128x128xbf16>
    %10 = arith.addf %8, %9 : vector<128x128xbf16>
    %cst_5 = arith.constant 5.000000e-01 : bf16
    %11 = vector.broadcast %cst_5 : bf16 to vector<128x128xbf16>
    %12 = arith.mulf %11, %10 : vector<128x128xbf16>
    %c0_6 = arith.constant 0 : index
    %c0_7 = arith.constant 0 : index
    %13 = vector.load %arg4[%c0_6, %c0_7] : memref<128x128xbf16, #tpu.memory_space<vmem>>, vector<128x128xbf16>
    tpu.vector_store %arg4[%c0_6, %c0_7], %12 {strides = array<i32>} : memref<128x128xbf16, #tpu.memory_space<vmem>>, vector<128x128xbf16>,
    return
  }
  func.func @transform_0(%arg0: i32, %arg1: i32) -> (i32, i32) {
    %c0_i32 = arith.constant 0 : i32
    %c0_i32_0 = arith.constant 0 : i32
    return %arg0, %c0_i32 : i32, i32
  }
  func.func @transform_1(%arg0: i32, %arg1: i32) -> (i32, i32) {
    %c0_i32 = arith.constant 0 : i32
    %c0_i32_0 = arith.constant 0 : i32
    return %arg1, %c0_i32 : i32, i32
  }
  func.func @transform_2(%arg0: i32, %arg1: i32) -> (i32, i32) {
    %c0_i32 = arith.constant 0 : i32
    return %arg0, %arg1 : i32, i32
  }
}

</mosaic_0001>

<bundles_post_ra>
// kernel: tpu_custom_call.1
= control target key start
LH: loop header
LB: loop body
LE: loop exit
PB: predicated region body
PF: predicated region fallthrough
CT: control target
= control target key end

     0   :  { %7 = vsyncpa [#allocation3], 0  ;;  %s1156_s0 = inlined_call_operand.vmem [shape: f32[256,32], index: 0, kind: input, shape index: {}]   ;;  %s1157_s1 = inlined_call_operand.vmem [shape: f32[256,32], index: 1, kind: input, shape index: {}]   ;;  %s1158_s2 = inlined_call_operand.hbm [shape: bf16[256,256], index: 2, kind: output, shape index: {}]  }
   0x1   :  { %9 = vsyncpa [#allocation3 + $0x1], 0  ;;  %s925_s9 = smov 0   ;;  %s927_s10 = smov 0  }
   0x2   :  { %s929_s11 = smov 0   ;;  %s931_s12 = smov 0  }
   0x3   :  { %s933_s13 = smov 0   ;;  %s935_s14 = smov 0  }
   0x4   :  { %s937_s15 = smov 0   ;;  %s939_s16 = smov 0  }
   0x5 LB: > { %s601_s17 = sadd.s32 4294967295, %s904_s16   ;;  %s602_s18 = sadd.s32 4294967294, %s904_s16   ;;  %s904_s16 = sphi %s939_s16, %s15_s16   ;;  %s900_s15 = sphi %s937_s15, %s1167_s15   ;;  %s896_s14 = sphi %s935_s14, %s1166_s14   ;;  %s892_s13 = sphi %s933_s13, %s1165_s13   ;;  %s888_s12 = sphi %s931_s12, %s1164_s12   ;;  %s884_s11 = sphi %s929_s11, %s1163_s11   ;;  %s880_s10 = sphi %s927_s10, %s1162_s10   ;;  %s876_s9 = sphi %s925_s9, %s1161_s9  }
   0x6   : > { %s24_s19 = sadd.s32 1, %s896_s14  ;;  %s27_s20 = sadd.s32 1, %s900_s15 }
   0x7   : > { %p25_p0 = scmp.ge.s32.totalorder %s24_s19, 2  ;;  %p98_p1 = scmp.ne.s32.totalorder %s884_s11, %s880_s10 }
   0x8   : > { %p99_p2 = scmp.eq.s32.totalorder %s601_s17, 3  ;;  %p104_p5 = scmp.ne.s32.totalorder %s880_s10, %s876_s9 }
   0x9   : > { %s1169_s19 = smov (%p25_p0, %s24_s19), 0  ;;  %s1171_s20 = smov (!%p25_p0, %s27_s20), %s900_s15 }
   0xa   : > { %s84_s21 = ssub.s32 %s896_s14, %s1169_s19  ;;  %p976_p3 = por %p99_p2, %p98_p1 }
   0xb   : > { %p29_p4 = scmp.ge.s32.totalorder %s1171_s20, 2  ;;  %p105_p6 = scmp.eq.s32.totalorder %s602_s18, 3 }
   0xc   : > { %p605_p7 = scmp.ge.s32.totalorder %s904_s16, 1  ;;  %p141_p9 = scmp.lt.s32.totalorder %s904_s16, 5 }
   0xd   : > { %s1173_s20 = smov (%p29_p4, %s1171_s20), 0  ;;  %p985_p8 = por %p105_p6, %p104_p5 }
   0xe   : > { %s83_s24 = ssub.s32 %s900_s15, %s1173_s20  ;;  %s88_s25 = sadd.s32 1, %s884_s11 }
   0xf   : > { %s85_s26 = sor.u32 %s84_s21, %s83_s24  ;;  %p142_p10 = pnand %p605_p7, %p141_p9 }
  0x10   : > { %p86_p11 = scmp.eq.s32.totalorder %s85_s26, 0  ;;  %s609_s28 = sshll.u32 (!%p142_p10), %s888_s12, 4 }
  0x11   : > { %145 = sbr.rel (%p142_p10) target bundleno = 338 (0x152), region = 28  ;;  %s607_s29 = sshll.u32 (!%p142_p10), %s892_s13, 4 }
  0x12   : > { %s994_s27 = scalar_select %p86_p11, %s884_s11, %s88_s25  }
  0x13   : > { %p175_p12 = scmp.lt.s32.totalorder (!%p142_p10), %s609_s28, 31  ;;  %p169_p13 = scmp.lt.s32.totalorder (!%p142_p10), %s607_s29, 31 }
  0x14   : > { %s165_s18 = sand.u32 (!%p142_p10), 1, %s880_s10   ;;  %s641_s24 = sshll.u32 (!%p142_p10), %s892_s13, 5 }
  0x15   : > { %s606_s21 = sshll.u32 (!%p142_p10), %s165_s18, 6  ;;  %s511_s13 = sadd.s32 (!%p142_p10), %s888_s12, %s641_s24 }
  0x16   : > { %s1175_s28 = smov (!%p175_p12, %s609_s28), 31  ;;  %s1177_s29 = smov (!%p169_p13, %s607_s29), 31  ;;  %vm248_vm0 = vcmask 261120  }
  0x17   : > { %s610_s30 = sshll.u32 %s1175_s28, 3  ;;  %s608_s6 = sshll.u32 %s1177_s29, 3 }
  0x18   : > { %s1001_s5 = scalar_lea.vmem %s1157_s1, %s610_s30  ;;  %s1010_s17 = scalar_lea.vmem %s1156_s0, %s608_s6 }
  0x19   : > { %v238_v0 = vld [vmem:[%s1001_s5 + $0x70] sm:$0xff]  ;;  %v239_v1 = vld [vmem:[%s1001_s5 + $0x78] sm:$0xff]  ;;  %v236_v2 = vld [vmem:[%s1001_s5 + $0x60] sm:$0xff]  ;;  %s1076_s25 = scalar_lea.vmem [#allocation2], %s606_s21  ;;  %s638_s26 = sshll.u32 %s511_s13, 6 }
  0x1a   : > { %v247_v3 = vpack.c.bf16 %v239_v1, %v238_v0  ;;  %v237_v4 = vld [vmem:[%s1001_s5 + $0x68] sm:$0xff]  ;;  %v234_v7 = vld [vmem:[%s1001_s5 + $0x50] sm:$0xff]  ;;  %v184_v8 = vld [vmem:[%s1010_s17] sm:$0xff]  ;;  %s514_s28 = sshll.u32 %s1076_s25, 4  ;;  %s1091_s30 = scalar_lea.hbm %s1158_s2, %s638_s26  ;;  %s1095_s28 = int_to_ptr.vmem [resolvable:$true] %s514_s28 }
  0x1b   : > { %v246_v5 = vpack.c.bf16 %v237_v4, %v236_v2  ;;  %v185_v9 = vld [vmem:[%s1010_s17 + $0x8] sm:$0xff]  ;;  %v235_v10 = vld [vmem:[%s1001_s5 + $0x58] sm:$0xff]  ;;  %v200_v11 = vmul.f32 0.5, %v184_v8  ;;  %v192_v12 = vld [vmem:[%s1010_s17 + $0x40] sm:$0xff]  ;;  %s1105_s3 = scalar_lea.sflag [#allocation3], %s165_s18  ;;  %s812_s4 = scalar_lea.vmem %s1095_s28, 1024 }
  0x1c   : > { %706 = vmatprep.subr.msk.bf16.mxu0 %vm248_vm0, %v247_v3  ;;  %707 = vmatprep.subr.msk.bf16.mxu1 %vm248_vm0, %v247_v3  ;;  %v295_v6 = vsel %vm248_vm0, %v247_v3, 0  ;;  %v193_v13 = vld [vmem:[%s1010_s17 + $0x48] sm:$0xff]  ;;  %v201_v14 = vmul.f32 0.5, %v185_v9  ;;  %v208_v15 = vmul.f32 0.5, %v192_v12  ;;  %v245_v18 = vpack.c.bf16 %v235_v10, %v234_v7  ;;  %v232_v21 = vld [vmem:[%s1001_s5 + $0x40] sm:$0xff]  ;;  %v230_v25 = vld [vmem:[%s1001_s5 + $0x30] sm:$0xff]  ;;  %p813_p0 = scmp.ne.s32.totalorder %s1095_s28, %s812_s4 }
  0x1d   : > { %659 = vmatpush3.bf16.xpose.msra.mxu0 %v295_v6  ;;  %698 = vmatpush3.bf16.xpose.msra.mxu1 %v295_v6  ;;  %v209_v16 = vmul.f32 0.5, %v193_v13  ;;  %v292_v17 = vsel %vm248_vm0, %v246_v5, 0  ;;  %v233_v22 = vld [vmem:[%s1001_s5 + $0x48] sm:$0xff]  ;;  %v231_v26 = vld [vmem:[%s1001_s5 + $0x38] sm:$0xff]  ;;  %v228_v29 = vld [vmem:[%s1001_s5 + $0x20] sm:$0xff] }
  0x1e   : > { %708 = vmatprep.subr.msk.bf16.mxu0 %vm248_vm0, %v246_v5  ;;  %709 = vmatprep.subr.msk.bf16.mxu1 %vm248_vm0, %v246_v5  ;;  %v216_v19 = vpack.c.bf16 %v201_v14, %v200_v11  ;;  %v289_v23 = vsel %vm248_vm0, %v245_v18, 0  ;;  %v244_v24 = vpack.c.bf16 %v233_v22, %v232_v21  ;;  %v243_v28 = vpack.c.bf16 %v231_v26, %v230_v25  ;;  %v229_v30 = vld [vmem:[%s1001_s5 + $0x28] sm:$0xff]  ;;  %v226_v33 = vld [vmem:[%s1001_s5 + $0x10] sm:$0xff]  ;;  %v227_v34 = vld [vmem:[%s1001_s5 + $0x18] sm:$0xff]  ;;  %p814_p1 = pnand %p813_p0, %p976_p3 }
  0x1f   : > { %v220_v20 = vpack.c.bf16 %v209_v16, %v208_v15  ;;  %v242_v32 = vpack.c.bf16 %v229_v30, %v228_v29  ;;  %v241_v36 = vpack.c.bf16 %v227_v34, %v226_v33  ;;  %v224_v37 = vld [vmem:[%s1001_s5] sm:$0xff]  ;;  %v225_v38 = vld [vmem:[%s1001_s5 + $0x8] sm:$0xff]  ;;  %v186_v41 = vld [vmem:[%s1010_s17 + $0x10] sm:$0xff]  ;;  %s906_s5 = smov [#allocation2]  }
  0x20   : > { %674 = vmatprep.mubr.msk.bf16.mxu0 %vm248_vm0, %v216_v19  ;;  %v286_v27 = vsel %vm248_vm0, %v244_v24, 0  ;;  %v283_v31 = vsel %vm248_vm0, %v243_v28, 0  ;;  %v240_v40 = vpack.c.bf16 %v225_v38, %v224_v37  ;;  %v187_v42 = vld [vmem:[%s1010_s17 + $0x18] sm:$0xff]  ;;  %v194_v43 = vld [vmem:[%s1010_s17 + $0x50] sm:$0xff]  ;;  %v188_v45 = vld [vmem:[%s1010_s17 + $0x20] sm:$0xff]  ;;  %v202_v50 = vmul.f32 0.5, %v186_v41  ;;  %p815_p2 = pneg %p814_p1 }
  0x21   : > { %682 = vmatprep.mubr.msk.bf16.mxu1 %vm248_vm0, %v220_v20  ;;  %v280_v35 = vsel %vm248_vm0, %v242_v32, 0  ;;  %v277_v39 = vsel %vm248_vm0, %v241_v36, 0  ;;  %v195_v44 = vld [vmem:[%s1010_s17 + $0x58] sm:$0xff]  ;;  %v189_v47 = vld [vmem:[%s1010_s17 + $0x28] sm:$0xff]  ;;  %v196_v48 = vld [vmem:[%s1010_s17 + $0x60] sm:$0xff]  ;;  %v203_v51 = vmul.f32 0.5, %v187_v42 }
  0x22   : > { %v274_v46 = vsel %vm248_vm0, %v240_v40, 0  ;;  %v197_v49 = vld [vmem:[%s1010_s17 + $0x68] sm:$0xff]  ;;  %v210_v52 = vmul.f32 0.5, %v194_v43  ;;  %v211_v53 = vmul.f32 0.5, %v195_v44  ;;  %v204_v54 = vmul.f32 0.5, %v188_v45  ;;  %v190_v60 = vld [vmem:[%s1010_s17 + $0x30] sm:$0xff] }
  0x23   : > { %v205_v55 = vmul.f32 0.5, %v189_v47  ;;  %v212_v56 = vmul.f32 0.5, %v196_v48  ;;  %v213_v57 = vmul.f32 0.5, %v197_v49  ;;  %v217_v58 = vpack.c.bf16 %v203_v51, %v202_v50  ;;  %v191_v63 = vld [vmem:[%s1010_s17 + $0x38] sm:$0xff]  ;;  %v198_v0 = vld [vmem:[%s1010_s17 + $0x70] sm:$0xff]  ;;  %s816_s6 = sshll.u32 %s906_s5, 4  ;;  %s817_s6 = int_to_ptr.vmem [resolvable:$false] %s816_s6 }
  0x24   : > { %v221_v59 = vpack.c.bf16 %v211_v53, %v210_v52  ;;  %v199_v1 = vld [vmem:[%s1010_s17 + $0x78] sm:$0xff]  ;;  %v206_v2 = vmul.f32 0.5, %v190_v60  ;;  %v207_v3 = vmul.f32 0.5, %v191_v63  ;;  %v214_v4 = vmul.f32 0.5, %v198_v0  ;;  %s818_s7 = scalar_lea.vmem %s817_s6, 2048  ;;  %p819_p4 = scmp.lt.s32.totalorder %s1095_s28, %s817_s6 }
  0x25   : > { %661 = vmatpush3.bf16.xpose.msra.mxu0 %v292_v17  ;;  %699 = vmatpush3.bf16.xpose.msra.mxu1 %v292_v17  ;;  %v218_v61 = vpack.c.bf16 %v205_v55, %v204_v54  ;;  %v222_v62 = vpack.c.bf16 %v213_v57, %v212_v56  ;;  %v215_v5 = vmul.f32 0.5, %v199_v1  ;;  %p820_p5 = scmp.lt.s32.totalorder %s818_s7, %s812_s4 }
  0x26   : > { %710 = vmatprep.subr.msk.bf16.mxu0 %vm248_vm0, %v245_v18  ;;  %711 = vmatprep.subr.msk.bf16.mxu1 %vm248_vm0, %v245_v18  ;;  %v219_v6 = vpack.c.bf16 %v207_v3, %v206_v2 }
  0x27   : > { %v223_v7 = vpack.c.bf16 %v215_v5, %v214_v4  ;;  %p821_p6 = por %p820_p5, %p819_p4 }
  0x29   : > { %p822_p7 = pnand %p821_p6, %p815_p2 }
  0x2d   : > { %663 = vmatpush3.bf16.xpose.msra.mxu0 %v289_v23  ;;  %700 = vmatpush3.bf16.xpose.msra.mxu1 %v289_v23 }
  0x2e   : > { %712 = vmatprep.subr.msk.bf16.mxu0 %vm248_vm0, %v244_v24  ;;  %713 = vmatprep.subr.msk.bf16.mxu1 %vm248_vm0, %v244_v24 }
  0x35   : > { %665 = vmatpush3.bf16.xpose.msra.mxu0 %v286_v27  ;;  %701 = vmatpush3.bf16.xpose.msra.mxu1 %v286_v27 }
  0x36   : > { %714 = vmatprep.subr.msk.bf16.mxu0 %vm248_vm0, %v243_v28  ;;  %715 = vmatprep.subr.msk.bf16.mxu1 %vm248_vm0, %v243_v28 }
  0x3d   : > { %667 = vmatpush3.bf16.xpose.msra.mxu0 %v283_v31  ;;  %702 = vmatpush3.bf16.xpose.msra.mxu1 %v283_v31 }
  0x3e   : > { %716 = vmatprep.subr.msk.bf16.mxu0 %vm248_vm0, %v242_v32  ;;  %717 = vmatprep.subr.msk.bf16.mxu1 %vm248_vm0, %v242_v32 }
  0x45   : > { %669 = vmatpush3.bf16.xpose.msra.mxu0 %v280_v35  ;;  %703 = vmatpush3.bf16.xpose.msra.mxu1 %v280_v35 }
  0x46   : > { %718 = vmatprep.subr.msk.bf16.mxu0 %vm248_vm0, %v241_v36  ;;  %719 = vmatprep.subr.msk.bf16.mxu1 %vm248_vm0, %v241_v36 }
  0x4d   : > { %671 = vmatpush3.bf16.xpose.msra.mxu0 %v277_v39  ;;  %704 = vmatpush3.bf16.xpose.msra.mxu1 %v277_v39 }
  0x4e   : > { %720 = vmatprep.subr.msk.bf16.mxu0 %vm248_vm0, %v240_v40  ;;  %721 = vmatprep.subr.msk.bf16.mxu1 %vm248_vm0, %v240_v40 }
  0x55   : > { %673 = vmatpush3.bf16.xpose.msra.mxu0 %v274_v46  ;;  %705 = vmatpush3.bf16.xpose.msra.mxu1 %v274_v46 }
  0x5c   : > { %675 = vmatmul.mubr.msk.bf16.vlgmr.msra.gmra.mxu0 %vm248_vm0, %v217_v58  ;;  %683 = vmatmul.mubr.msk.bf16.vlgmr.msra.gmra.mxu1 %vm248_vm0, %v221_v59 }
  0x5d   : > { %678 = vmatprep.mubr.msk.bf16.mxu0 %vm248_vm0, %v218_v61  ;;  %686 = vmatprep.mubr.msk.bf16.mxu1 %vm248_vm0, %v222_v62 }
  0x64   : > { %679 = vmatmul.mubr.msk.bf16.gmra.mxu0 %vm248_vm0, %v219_v6  ;;  %687 = vmatmul.mubr.msk.bf16.gmra.mxu1 %vm248_vm0, %v223_v7 }
 0x11c   : > { %v676_v8 = vpop.f32.mrf.mxu0  ;;  %v684_v9 = vpop.f32.mrf.mxu1 }
 0x11e   : > { %v331_v10 = vpop.f32.mrf.mxu0  ;;  %v363_v11 = vpop.f32.mrf.mxu1 }
 0x120   : > { %v677_v12 = vpop.f32.mrf.mxu0  ;;  %v685_v13 = vpop.f32.mrf.mxu1 }
 0x121   : > { %v395_v14 = vpack.c.bf16 %v677_v12, %v676_v8  ;;  %v399_v15 = vpack.c.bf16 %v685_v13, %v684_v9 }
 0x122   : > { %v334_v16 = vpop.f32.mrf.mxu0  ;;  %v366_v17 = vpop.f32.mrf.mxu1 }
 0x123   : > { %796 = vtanh.bf16 %v395_v14  ;;  %v394_v18 = vpack.c.bf16 %v334_v16, %v331_v10  ;;  %v398_v19 = vpack.c.bf16 %v366_v17, %v363_v11 }
 0x124   : > { %798 = vtanh.bf16 %v399_v15  ;;  %v680_v20 = vpop.f32.mrf.mxu0  ;;  %v688_v21 = vpop.f32.mrf.mxu1 }
 0x125   : > { %800 = vtanh.bf16 %v394_v18 }
 0x126   : > { %802 = vtanh.bf16 %v398_v19  ;;  %v347_v22 = vpop.f32.mrf.mxu0  ;;  %v379_v23 = vpop.f32.mrf.mxu1 }
 0x128   : > { %v681_v24 = vpop.f32.mrf.mxu0  ;;  %v689_v25 = vpop.f32.mrf.mxu1 }
 0x129   : > { %v397_v26 = vpack.c.bf16 %v681_v24, %v680_v20  ;;  %v401_v27 = vpack.c.bf16 %v689_v25, %v688_v21 }
 0x12a   : > { %v350_v28 = vpop.f32.mrf.mxu0  ;;  %v382_v29 = vpop.f32.mrf.mxu1 }
 0x12b   : > { %804 = vtanh.bf16 %v397_v26  ;;  %v396_v30 = vpack.c.bf16 %v350_v28, %v347_v22  ;;  %v400_v31 = vpack.c.bf16 %v382_v29, %v379_v23 }
 0x12c   : > { %806 = vtanh.bf16 %v401_v27 }
 0x12d   : > { %808 = vtanh.bf16 %v396_v30 }
 0x12e   : > { %810 = vtanh.bf16 %v400_v31 }
 0x131   : > { %v797_v32 = vpop.eup %796 }
 0x132   : > { %v799_v33 = vpop.eup %798  ;;  %v411_v34 = vadd.bf16 1065369472, %v797_v32 }
 0x133   : > { %v801_v35 = vpop.eup %800  ;;  %v415_v36 = vadd.bf16 1065369472, %v799_v33 }
 0x134   : > { %v803_v37 = vpop.eup %802  ;;  %v419_v38 = vmul.bf16 1056980736, %v411_v34  ;;  %v410_v39 = vadd.bf16 1065369472, %v801_v35 }
 0x135   : > { %v423_v40 = vmul.bf16 1056980736, %v415_v36  ;;  %v414_v41 = vadd.bf16 1065369472, %v803_v37 }
 0x136   : > { %v621_v42 = vcombine.low %v419_v38, %v419_v38  ;;  %v622_v43 = vcombine.high %v419_v38, %v419_v38  ;;  %v418_v44 = vmul.bf16 1056980736, %v410_v39 }
 0x137   : > { %v629_v45 = vcombine.low %v423_v40, %v423_v40  ;;  %v630_v46 = vcombine.high %v423_v40, %v423_v40  ;;  %v422_v47 = vmul.bf16 1056980736, %v414_v41 }
 0x138   : > { %484 = vst [vmem:[%s1076_s25 + $0x8] sm:$0xf] %v621_v42  ;;  %485 = vst [vmem:[%s1076_s25 + $0xc] sm:$0xf] %v622_v43  ;;  %v619_v48 = vcombine.low %v418_v44, %v418_v44  ;;  %v620_v49 = vcombine.high %v418_v44, %v418_v44 }
 0x139   : > { %v805_v50 = vpop.eup %804  ;;  %492 = vst [vmem:[%s1076_s25 + $0x28] sm:$0xf] %v629_v45  ;;  %493 = vst [vmem:[%s1076_s25 + $0x2c] sm:$0xf] %v630_v46  ;;  %v627_v51 = vcombine.low %v422_v47, %v422_v47  ;;  %v628_v52 = vcombine.high %v422_v47, %v422_v47 }
 0x13a   : > { %v807_v53 = vpop.eup %806  ;;  %482 = vst [vmem:[%s1076_s25] sm:$0xf] %v619_v48  ;;  %483 = vst [vmem:[%s1076_s25 + $0x4] sm:$0xf] %v620_v49  ;;  %v413_v54 = vadd.bf16 1065369472, %v805_v50 }
 0x13b   : > { %v809_v55 = vpop.eup %808  ;;  %490 = vst [vmem:[%s1076_s25 + $0x20] sm:$0xf] %v627_v51  ;;  %491 = vst [vmem:[%s1076_s25 + $0x24] sm:$0xf] %v628_v52  ;;  %v417_v56 = vadd.bf16 1065369472, %v807_v53 }
 0x13c   : > { %v811_v57 = vpop.eup %810  ;;  %v421_v58 = vmul.bf16 1056980736, %v413_v54  ;;  %v412_v59 = vadd.bf16 1065369472, %v809_v55 }
 0x13d   : > { %v425_v60 = vmul.bf16 1056980736, %v417_v56  ;;  %v416_v61 = vadd.bf16 1065369472, %v811_v57 }
 0x13e   : > { %v625_v62 = vcombine.low %v421_v58, %v421_v58  ;;  %v626_v63 = vcombine.high %v421_v58, %v421_v58  ;;  %v420_v0 = vmul.bf16 1056980736, %v412_v59 }
 0x13f   : > { %v633_v1 = vcombine.low %v425_v60, %v425_v60  ;;  %v634_v2 = vcombine.high %v425_v60, %v425_v60  ;;  %v424_v3 = vmul.bf16 1056980736, %v416_v61 }
 0x140   : > { %488 = vst [vmem:[%s1076_s25 + $0x18] sm:$0xf] %v625_v62  ;;  %489 = vst [vmem:[%s1076_s25 + $0x1c] sm:$0xf] %v626_v63  ;;  %v623_v4 = vcombine.low %v420_v0, %v420_v0  ;;  %v624_v5 = vcombine.high %v420_v0, %v420_v0 }
 0x141   : > { %496 = vst [vmem:[%s1076_s25 + $0x38] sm:$0xf] %v633_v1  ;;  %497 = vst [vmem:[%s1076_s25 + $0x3c] sm:$0xf] %v634_v2  ;;  %v631_v6 = vcombine.low %v424_v3, %v424_v3  ;;  %v632_v7 = vcombine.high %v424_v3, %v424_v3 }
 0x142   : > { %486 = vst [vmem:[%s1076_s25 + $0x10] sm:$0xf] %v623_v4  ;;  %487 = vst [vmem:[%s1076_s25 + $0x14] sm:$0xf] %v624_v5 }
 0x143   : > { %494 = vst [vmem:[%s1076_s25 + $0x30] sm:$0xf] %v631_v6  ;;  %495 = vst [vmem:[%s1076_s25 + $0x34] sm:$0xf] %v632_v7 }
 0x144   : > { %825 = shalt.err (!%p822_p7)
}
 0x145   : > { %s826_s8 = scalar_lea.hbm %s1091_s30, 1024  ;;  %s830_s21 = scalar_lea.hbm %s1158_s2, 4096 }
 0x146   : > { %p827_p9 = scmp.ne.s32.totalorder %s1091_s30, %s826_s8  ;;  %p831_p12 = scmp.lt.s32.totalorder %s1091_s30, %s1158_s2 }
 0x147   : > { %p832_p13 = scmp.lt.s32.totalorder %s830_s21, %s826_s8 }
 0x148   : > { %p828_p10 = pnand %p827_p9, %p976_p3 }
 0x149   : > { %p833_p0 = por %p832_p13, %p831_p12 }
 0x14a   : > { %p829_p11 = pneg %p828_p10 }
 0x14c   : > { %p834_p1 = pnand %p833_p0, %p829_p11 }
 0x14e   : > { %837 = shalt.err (!%p834_p1)
}
 0x14f   : > { %s907_s13 = smov 64   ;;  %s908_s26 = smov 128  }
 0x150   : > { %s909_s12 = smov 4  }
 0x151   : > { %722 = dma.vmem_to_hbm [thread:$0]  (%p976_p3), %s1095_s28, 1024, %s1091_s30, %s1105_s3, %s907_s13, %s908_s26, %s909_s12  }
 0x152 PF: > { %p728_p2 = scmp.ge.s32.totalorder %s904_s16, 2  ;;  %s529_s29 = sand.u32 1, %s876_s9  }
 0x153   : > { %s530_s4 = scalar_lea.sflag [#allocation3], %s529_s29 }
 0x154   : > { %p725_p4 = pnand %p728_p2, %p985_p8 }
 0x156   : > { %p726_p5 = pneg %p725_p4 }
 0x158   : > { %871 = dma.done.wait (%p726_p5), %s530_s4, 1024  }
 0x159   : > { %873 = vsyncadd (%p726_p5), %s530_s4, 4294966272  ;;  %s15_s16 = sadd.s32 1, %s904_s16   ;;  %s1161_s9 = smov %s880_s10 }
 0x15a   : > { %p12_p6 = scmp.ge.s32.totalorder %s15_s16, 6   ;;  %s1162_s10 = smov %s884_s11 }
 0x15b   : > { %s1163_s11 = smov %s994_s27  ;;  %s1164_s12 = smov %s896_s14 }
 0x15c   : > { %s1165_s13 = smov %s900_s15  ;;  %s1166_s14 = smov %s1169_s19 }
 0x15d   : > { %s1167_s15 = smov %s1173_s20  ;;  %14 = sbr.rel (!%p12_p6) target bundleno = 5 (0x5), region = 66 }
 0x162   :  { %535 = vsyncpa [#allocation3], 1 }
 0x163   :  { %537 = vsyncpa [#allocation3 + $0x1], 1 }

</bundles_post_ra>
